<compile_context>
chip_gen: v7x
topology: tpu7x:2x2x1
jax: 0.10.0
libtpu: 0.0.40
codegen_flags: <defaults>
</compile_context>

<pallas_src>
import functools
import math

import jax
import jax.numpy as jnp
from jax.experimental import pallas as pl
from jax.experimental.pallas import tpu as pltpu

IN_FEATURES = 28 * 28   # 784
NUM_FEATURES = 2
F_PAD = 128             # lane-dense padded feature width
TB_MAX = 2048           # max batch tile (f32 input): ~6.3 MiB/tile, 2x buffered
ROW_ALIGN = 16          # bf16 output packs 16 sublanes per vreg


def _encoder_kernel(x_ref, w_ref, b_ref, o_ref):
    # Cast f32 -> bf16 on the (otherwise idle) VPU, matmul on the MXU with f32
    # accumulation, bias + ReLU in f32, store bf16.
    x_bf = x_ref[...].astype(jnp.bfloat16)
    y = jnp.dot(x_bf, w_ref[...], preferred_element_type=jnp.float32)
    o_ref[...] = jnp.maximum(y + b_ref[...], 0.0).astype(o_ref.dtype)


def prepare_params(w, b):
    """One-time prep: bf16 weight padded to (784, 128), f32 bias padded to (1, 128)."""
    num_features = w.shape[1]
    w_padded = jnp.zeros((IN_FEATURES, F_PAD), jnp.bfloat16)
    w_padded = w_padded.at[:, :num_features].set(w.astype(jnp.bfloat16))
    b_padded = jnp.zeros((1, F_PAD), jnp.float32)
    b_padded = b_padded.at[:, :num_features].set(
        b.reshape(1, num_features).astype(jnp.float32))
    return w_padded, b_padded


@functools.partial(jax.jit, static_argnames=("num_features",))
def simple_encoder_forward(x, w_padded, b_padded, *, num_features=NUM_FEATURES):
    """x: anything that flattens to (B, 784).  Returns (B, 1, num_features) f32."""
    x2d = x.reshape(-1, IN_FEATURES)   # no dtype cast here: kernel casts in VMEM
    batch = x2d.shape[0]

    # Balanced batch tiles: as large as possible (<= TB_MAX), 16-row aligned,
    # and >=2 tiles when the batch allows it (keeps both v7x TCs busy).
    n_tiles = pl.cdiv(batch, TB_MAX)
    if n_tiles == 1 and batch >= 2 * ROW_ALIGN:
        n_tiles = 2
    tb = ((batch + n_tiles - 1) // n_tiles + ROW_ALIGN - 1) // ROW_ALIGN * ROW_ALIGN
    padded_rows = n_tiles * tb
    if padded_rows != batch:
        # Only ragged batches pay this; pad rows produce relu(bias) and are
        # sliced away below.
        x2d = jnp.pad(x2d, ((0, padded_rows - batch), (0, 0)))

    out = pl.pallas_call(
        _encoder_kernel,
        out_shape=jax.ShapeDtypeStruct((padded_rows, F_PAD), jnp.bfloat16),
        grid=(n_tiles,),
        in_specs=[
            pl.BlockSpec((tb, IN_FEATURES), lambda i: (i, 0)),        # x tile (f32)
            pl.BlockSpec((IN_FEATURES, F_PAD), lambda i: (0, 0)),     # weight (resident)
            pl.BlockSpec((1, F_PAD), lambda i: (0, 0)),               # bias (resident)
        ],
        out_specs=pl.BlockSpec((tb, F_PAD), lambda i: (i, 0)),
        compiler_params=pltpu.CompilerParams(
            dimension_semantics=("parallel",),   # shard batch tiles across v7x's 2 TCs
            vmem_limit_bytes=32 << 20,           # ~14 MiB working set; safe on 64 MiB v7x
        ),
    )(x2d, w_padded, b_padded)

    # Slice away lane/batch padding, restore f32, match PyTorch (B, 1, F) shape.
    return (out[:batch, :num_features]
            .astype(jnp.float32)
            .reshape(batch, 1, num_features))


def init_params(key, in_features=IN_FEATURES, num_features=NUM_FEATURES):
    """Deterministic init mimicking torch.nn.Linear's U(-1/sqrt(fan_in), +)."""
    kw, kb = jax.random.split(key)
    bound = 1.0 / math.sqrt(in_features)
    # Stored as (in, out) so the kernel does x @ W directly.
    w = jax.random.uniform(kw, (in_features, num_features),
                           minval=-bound, maxval=bound, dtype=jnp.float32)
    b = jax.random.uniform(kb, (num_features,),
                           minval=-bound, maxval=bound, dtype=jnp.float32)
    return w, b


if __name__ == "__main__":
    key = jax.random.PRNGKey(0)
    k_x, k_p = jax.random.split(key)

    # Small MNIST-like batch: (2, 1, 28, 28) NCHW.
    x = jax.random.normal(k_x, (2, 1, 28, 28), dtype=jnp.float32)
    w, b = init_params(k_p)
    w_padded, b_padded = prepare_params(w, b)

    out = simple_encoder_forward(x, w_padded, b_padded, num_features=NUM_FEATURES)
    out = jax.block_until_ready(out)

    # bf16-consistent reference (kernel casts x and w to bf16, accumulates f32,
    # stores bf16); tolerance absorbs the bf16 output rounding.
    x_bf = x.reshape(-1, 1, IN_FEATURES).astype(jnp.bfloat16).astype(jnp.float32)
    w_bf = w.astype(jnp.bfloat16).astype(jnp.float32)
    ref = jnp.maximum(x_bf @ w_bf + b, 0.0)

    assert out.shape == (2, 1, NUM_FEATURES), out.shape
    assert jnp.allclose(out, ref, atol=1e-2, rtol=1e-2), \
        float(jnp.max(jnp.abs(out - ref)))

    # Sanity vs full-f32 math (semantics of the PyTorch module), loose tolerance
    # to absorb the intentional bf16 MXU-operand / bf16-output tradeoff.
    ref_f32 = jnp.maximum(x.reshape(-1, 1, IN_FEATURES) @ w + b, 0.0)
    assert jnp.allclose(out, ref_f32, atol=5e-2, rtol=5e-2)

    print("KERNEL_OK")
</pallas_src>

<mosaic_0001>
module attributes {stable_mosaic.version = 11 : i64} {
  func.func @_encoder_kernel(%arg0: i32, %arg1: memref<16x784xf32, #tpu.memory_space<vmem>>, %arg2: memref<784x128xbf16, #tpu.memory_space<vmem>>, %arg3: memref<1x128xf32, #tpu.memory_space<vmem>>, %arg4: memref<16x128xbf16, #tpu.memory_space<vmem>>) attributes {dimension_semantics = [#tpu.dimension_semantics<parallel>], iteration_bounds = array<i64: 1>, scalar_prefetch = 0 : i64, scratch_operands = 0 : i64, tpu.core_type = #tpu.core_type<tc>, window_params = [{transform_indices = @transform_0, window_bounds = array<i64: 16, 784>}, {pipeline_mode = #tpu.pipeline_mode<synchronous>, transform_indices = @transform_1, window_bounds = array<i64: 784, 128>}, {pipeline_mode = #tpu.pipeline_mode<synchronous>, transform_indices = @transform_2, window_bounds = array<i64: 1, 128>}, {transform_indices = @transform_3, window_bounds = array<i64: 16, 128>}]} {
    %c0 = arith.constant 0 : index
    %c0_0 = arith.constant 0 : index
    %0 = vector.load %arg1[%c0, %c0_0] : memref<16x784xf32, #tpu.memory_space<vmem>>, vector<16x784xf32>
    %1 = arith.truncf %0 : vector<16x784xf32> to vector<16x784xbf16>
    %c0_1 = arith.constant 0 : index
    %c0_2 = arith.constant 0 : index
    %2 = vector.load %arg2[%c0_1, %c0_2] : memref<784x128xbf16, #tpu.memory_space<vmem>>, vector<784x128xbf16>
    %cst = arith.constant dense<0.000000e+00> : vector<16x128xf32>
    %3 = tpu.matmul %1, %2, %cst {dimension_numbers = #tpu.dot_dimension_numbers<[1], [0], [0], [1], [0, 0, 1, 1], [], []>} : vector<16x784xbf16>, vector<784x128xbf16>, vector<16x128xf32> -> vector<16x128xf32>
    %c0_3 = arith.constant 0 : index
    %c0_4 = arith.constant 0 : index
    %4 = vector.load %arg3[%c0_3, %c0_4] : memref<1x128xf32, #tpu.memory_space<vmem>>, vector<1x128xf32>
    %5 = vector.broadcast %4 : vector<1x128xf32> to vector<16x128xf32>
    %6 = arith.addf %3, %5 : vector<16x128xf32>
    %cst_5 = arith.constant 0.000000e+00 : f32
    %7 = vector.broadcast %cst_5 : f32 to vector<16x128xf32>
    %8 = arith.maximumf %6, %7 : vector<16x128xf32>
    %9 = arith.truncf %8 : vector<16x128xf32> to vector<16x128xbf16>
    %c0_6 = arith.constant 0 : index
    %c0_7 = arith.constant 0 : index
    %10 = vector.load %arg4[%c0_6, %c0_7] : memref<16x128xbf16, #tpu.memory_space<vmem>>, vector<16x128xbf16>
    tpu.vector_store %arg4[%c0_6, %c0_7], %9 {strides = array<i32>} : memref<16x128xbf16, #tpu.memory_space<vmem>>, vector<16x128xbf16>,
    return
  }
  func.func @transform_0(%arg0: i32) -> (i32, i32) {
    %c0_i32 = arith.constant 0 : i32
    %c0_i32_0 = arith.constant 0 : i32
    return %arg0, %c0_i32 : i32, i32
  }
  func.func @transform_1(%arg0: i32) -> (i32, i32) {
    %c0_i32 = arith.constant 0 : i32
    %c0_i32_0 = arith.constant 0 : i32
    %c0_i32_1 = arith.constant 0 : i32
    return %c0_i32, %c0_i32_0 : i32, i32
  }
  func.func @transform_2(%arg0: i32) -> (i32, i32) {
    %c0_i32 = arith.constant 0 : i32
    %c0_i32_0 = arith.constant 0 : i32
    %c0_i32_1 = arith.constant 0 : i32
    return %c0_i32, %c0_i32_0 : i32, i32
  }
  func.func @transform_3(%arg0: i32) -> (i32, i32) {
    %c0_i32 = arith.constant 0 : i32
    %c0_i32_0 = arith.constant 0 : i32
    return %arg0, %c0_i32 : i32, i32
  }
}

</mosaic_0001>

<bundles_post_ra>
// kernel: simple_encoder_forward.1
= control target key start
LH: loop header
LB: loop body
LE: loop exit
PB: predicated region body
PF: predicated region fallthrough
CT: control target
= control target key end

     0   :  { %8 = vsyncpa [#allocation3], 0  ;;  %s846_s12 = smov [#allocation2]   ;;  %s931_s0 = inlined_call_operand.vmem [shape: f32[16,784], index: 0, kind: input, shape index: {}]   ;;  %s932_s1 = inlined_call_operand.hbm [shape: bf16[784,128], index: 1, kind: input, shape index: {}]   ;;  %s933_s2 = inlined_call_operand.vmem [shape: f32[1,128], index: 2, kind: input, shape index: {}]   ;;  %s934_s3 = inlined_call_operand.vmem [shape: bf16[16,128], index: 3, kind: output, shape index: {}]  }
   0x1   :  { %s16_s13 = sshll.u32 %s846_s12, 4  ;;  %s822_s16 = scalar_lea.hbm %s932_s1, 6272  ;;  %s17_s13 = int_to_ptr.vmem [resolvable:$true] %s16_s13 }
   0x2   :  { %p823_p0 = scmp.ne.s32.totalorder %s932_s1, %s822_s16  ;;  %p826_p1 = scmp.lt.u32.totalorder %s822_s16, %s932_s1 }
   0x4   :  { %p828_p2 = pnand %p826_p1, %p823_p0 }
   0x6   :  { %831 = shalt.err (!%p828_p2)
}
   0x7   :  { %s832_s21 = scalar_lea.vmem %s17_s13, 6272  ;;  %p837_p4 = scmp.lt.s32.totalorder %s17_s13, %s17_s13 }
   0x8   :  { %p833_p3 = scmp.ne.s32.totalorder %s17_s13, %s832_s21  ;;  %p838_p5 = scmp.lt.s32.totalorder %s832_s21, %s832_s21 }
   0xa   :  { %p839_p6 = por %p838_p5, %p837_p4 }
   0xc   :  { %p840_p7 = pnand %p839_p6, %p833_p3 }
   0xe   :  { %843 = shalt.err (!%p840_p7)
}
   0xf   :  { %s847_s22 = smov 64   ;;  %s848_s23 = smov 4  }
  0x10   :  { %22 = dma.hbm_to_vmem [thread:$0]  %s932_s1, 6272, %s17_s13, [#allocation3], %s847_s22, %s847_s22, %s848_s23  }
  0x11   :  { %844 = dma.done.wait [#allocation3], 6272  }
  0x12   :  { %845 = vsyncadd [#allocation3], 4294961024  ;;  %v773_v0 = vld [vmem:[#allocation2 + $0x40] sm:$0xff]   ;;  %v777_v4 = vld [vmem:[#allocation2 + $0x48] sm:$0xff]   ;;  %v849_v43 = vmov 0.0   ;;  %vm850_vm0 = vmmov 0  }
  0x13   :  { %v774_v1 = vld [vmem:[#allocation2] sm:$0xff]   ;;  %694 = vmatprep.subr.bf16.mxu0 %v773_v0  ;;  %v778_v5 = vld [vmem:[#allocation2 + $0x8] sm:$0xff]   ;;  %v781_v8 = vld [vmem:[#allocation2 + $0x50] sm:$0xff]   ;;  %vm449_vm1 = vcmask 130048  }
  0x14   :  { %v775_v2 = vld [vmem:[#allocation2 + $0xc0] sm:$0xff]   ;;  %695 = vmatpush3.bf16.msra.mxu0 %v774_v1  ;;  %v779_v6 = vld [vmem:[#allocation2 + $0xc8] sm:$0xff]   ;;  %v782_v9 = vld [vmem:[#allocation2 + $0x10] sm:$0xff]  }
  0x15   :  { %v776_v3 = vld [vmem:[#allocation2 + $0x80] sm:$0xff]   ;;  %716 = vmatprep.subr.bf16.mxu1 %v775_v2  ;;  %696 = vmatprep.subr.bf16.mxu0 %v777_v4  ;;  %v780_v7 = vld [vmem:[#allocation2 + $0x88] sm:$0xff]   ;;  %v783_v10 = vld [vmem:[#allocation2 + $0xd0] sm:$0xff]  }
  0x16   :  { %717 = vmatpush3.bf16.msra.mxu1 %v776_v3  ;;  %v784_v11 = vld [vmem:[#allocation2 + $0x90] sm:$0xff]   ;;  %v785_v12 = vld [vmem:[#allocation2 + $0x58] sm:$0xff]   ;;  %v789_v16 = vld [vmem:[#allocation2 + $0x60] sm:$0xff]  }
  0x17   :  { %718 = vmatprep.subr.bf16.mxu1 %v779_v6  ;;  %v786_v13 = vld [vmem:[#allocation2 + $0x18] sm:$0xff]   ;;  %v790_v17 = vld [vmem:[#allocation2 + $0x20] sm:$0xff]   ;;  %v793_v20 = vld [vmem:[#allocation2 + $0x68] sm:$0xff]  }
  0x18   :  { %697 = vmatpush3.bf16.msra.mxu0 %v778_v5  ;;  %v787_v14 = vld [vmem:[#allocation2 + $0xd8] sm:$0xff]   ;;  %v791_v18 = vld [vmem:[#allocation2 + $0xe0] sm:$0xff]   ;;  %v794_v21 = vld [vmem:[#allocation2 + $0x28] sm:$0xff]  }
  0x19   :  { %698 = vmatprep.subr.bf16.mxu0 %v781_v8  ;;  %v788_v15 = vld [vmem:[#allocation2 + $0x98] sm:$0xff]   ;;  %v792_v19 = vld [vmem:[#allocation2 + $0xa0] sm:$0xff]   ;;  %v795_v22 = vld [vmem:[#allocation2 + $0xe8] sm:$0xff]  }
  0x1a   :  { %719 = vmatpush3.bf16.msra.mxu1 %v780_v7  ;;  %v796_v23 = vld [vmem:[#allocation2 + $0xa8] sm:$0xff]   ;;  %v797_v24 = vld [vmem:[#allocation2 + $0x70] sm:$0xff]   ;;  %v801_v28 = vld [vmem:[#allocation2 + $0x78] sm:$0xff]  }
  0x1b   :  { %720 = vmatprep.subr.bf16.mxu1 %v783_v10  ;;  %v798_v25 = vld [vmem:[#allocation2 + $0x30] sm:$0xff]   ;;  %v802_v29 = vld [vmem:[#allocation2 + $0x38] sm:$0xff]   ;;  %v30_v31 = vld [vmem:[%s931_s0 + $0x8] sm:$0xff] }
  0x1c   :  { %699 = vmatpush3.bf16.msra.mxu0 %v782_v9  ;;  %v799_v26 = vld [vmem:[#allocation2 + $0xf0] sm:$0xff]   ;;  %v803_v30 = vld [vmem:[#allocation2 + $0xf8] sm:$0xff]   ;;  %v37_v32 = vld [vmem:[%s931_s0 + $0x40] sm:$0xff] }
  0x1d   :  { %700 = vmatprep.subr.bf16.mxu0 %v785_v12  ;;  %v800_v27 = vld [vmem:[#allocation2 + $0xb0] sm:$0xff]   ;;  %v44_v33 = vpack.c.bf16 %v37_v32, %v30_v31  ;;  %v804_v34 = vld [vmem:[#allocation2 + $0xb8] sm:$0xff]   ;;  %v29_v35 = vld [vmem:[%s931_s0] sm:$0xff] }
  0x1e   :  { %721 = vmatpush3.bf16.msra.mxu1 %v784_v11  ;;  %v36_v36 = vld [vmem:[%s931_s0 + $0x38] sm:$0xff]  ;;  %v805_v38 = vld [vmem:[#allocation2 + $0x140] sm:$0xff]   ;;  %v39_v40 = vld [vmem:[%s931_s0 + $0x50] sm:$0xff] }
  0x1f   :  { %722 = vmatprep.subr.bf16.mxu1 %v787_v14  ;;  %485 = vmatprep.mubr.bf16.mxu0 %v44_v33  ;;  %v43_v37 = vpack.c.bf16 %v36_v36, %v29_v35  ;;  %v32_v39 = vld [vmem:[%s931_s0 + $0x18] sm:$0xff]  ;;  %v806_v42 = vld [vmem:[#allocation2 + $0x100] sm:$0xff]   ;;  %v31_v44 = vld [vmem:[%s931_s0 + $0x10] sm:$0xff] }
  0x20   :  { %701 = vmatpush3.bf16.msra.mxu0 %v786_v13  ;;  %v46_v41 = vpack.c.bf16 %v39_v40, %v32_v39  ;;  %v38_v45 = vld [vmem:[%s931_s0 + $0x48] sm:$0xff]  ;;  %v809_v49 = vld [vmem:[#allocation2 + $0x150] sm:$0xff]   ;;  %v811_v51 = vld [vmem:[#allocation2 + $0x158] sm:$0xff]  }
  0x21   :  { %702 = vmatprep.subr.bf16.mxu0 %v789_v16  ;;  %v45_v46 = vpack.c.bf16 %v38_v45, %v31_v44  ;;  %v807_v47 = vld [vmem:[#allocation2 + $0x148] sm:$0xff]   ;;  %v810_v50 = vld [vmem:[#allocation2 + $0x110] sm:$0xff]   ;;  %v812_v52 = vld [vmem:[#allocation2 + $0x118] sm:$0xff]  }
  0x22   :  { %723 = vmatpush3.bf16.msra.mxu1 %v788_v15  ;;  %526 = vmatprep.mubr.bf16.mxu1 %v46_v41  ;;  %v808_v48 = vld [vmem:[#allocation2 + $0x108] sm:$0xff]   ;;  %v813_v53 = vld [vmem:[#allocation2 + $0x160] sm:$0xff]   ;;  %v35_v61 = vld [vmem:[%s931_s0 + $0x30] sm:$0xff] }
  0x23   :  { %724 = vmatprep.subr.bf16.mxu1 %v791_v18  ;;  %v814_v54 = vld [vmem:[#allocation2 + $0x120] sm:$0xff]   ;;  %v815_v55 = vld [vmem:[#allocation2 + $0x168] sm:$0xff]   ;;  %v817_v63 = vld [vmem:[#allocation2 + $0x170] sm:$0xff]  }
  0x24   :  { %703 = vmatpush3.bf16.msra.mxu0 %v790_v17  ;;  %v821_v56 = vld [vmem:[#allocation2 + $0x180] sm:$0xff]   ;;  %v34_v57 = vld [vmem:[%s931_s0 + $0x28] sm:$0xff]  ;;  %v818_v1 = vld [vmem:[#allocation2 + $0x130] sm:$0xff]  }
  0x25   :  { %704 = vmatprep.subr.bf16.mxu0 %v793_v20  ;;  %v41_v58 = vld [vmem:[%s931_s0 + $0x60] sm:$0xff]  ;;  %v816_v59 = vld [vmem:[#allocation2 + $0x128] sm:$0xff]   ;;  %v819_v2 = vld [vmem:[#allocation2 + $0x178] sm:$0xff]  }
  0x26   :  { %725 = vmatpush3.bf16.msra.mxu1 %v792_v19  ;;  %v48_v60 = vpack.c.bf16 %v41_v58, %v34_v57  ;;  %v42_v62 = vld [vmem:[%s931_s0 + $0x68] sm:$0xff]  ;;  %v820_v3 = vld [vmem:[#allocation2 + $0x138] sm:$0xff]   ;;  %v33_v4 = vld [vmem:[%s931_s0 + $0x20] sm:$0xff] }
  0x27   :  { %726 = vmatprep.subr.bf16.mxu1 %v795_v22  ;;  %v49_v0 = vpack.c.bf16 %v42_v62, %v35_v61  ;;  %v40_v5 = vld [vmem:[%s931_s0 + $0x58] sm:$0xff]  ;;  %v634_v8 = vld [vmem:[%s933_s2] ss:$0 sm:$0xff] }
  0x28   :  { %705 = vmatpush3.bf16.msra.mxu0 %v794_v21  ;;  %v47_v6 = vpack.c.bf16 %v40_v5, %v33_v4 }
  0x29   :  { %706 = vmatprep.subr.bf16.mxu0 %v797_v24 }
  0x2a   :  { %727 = vmatpush3.bf16.msra.mxu1 %v796_v23 }
  0x2b   :  { %728 = vmatprep.subr.bf16.mxu1 %v799_v26 }
  0x2c   :  { %707 = vmatpush3.bf16.msra.mxu0 %v798_v25 }
  0x2d   :  { %708 = vmatprep.subr.bf16.mxu0 %v801_v28 }
  0x2e   :  { %729 = vmatpush3.bf16.msra.mxu1 %v800_v27 }
  0x2f   :  { %730 = vmatprep.subr.bf16.mxu1 %v803_v30 }
  0x30   :  { %709 = vmatpush3.bf16.msra.mxu0 %v802_v29 }
  0x31   :  { %738 = vmatprep.subr.bf16.mxu0 %v805_v38 }
  0x32   :  { %731 = vmatpush3.bf16.msra.mxu1 %v804_v34 }
  0x33   :  { %762 = vmatprep.subr.bf16.mxu1 %v849_v43  ;;  %486 = vmatmul.mubr.bf16.vlgmr.msra.gmra.mrb[0].mxu0 %v43_v37 }
  0x34   :  { %739 = vmatpush3.bf16.msra.mxu0 %v806_v42  ;;  %567 = vmatprep.mubr.bf16.mxu0 %v48_v60 }
  0x35   :  { %527 = vmatmul.mubr.bf16.vlgmr.msra.gmra.mrb[0].mxu1 %v45_v46  ;;  %740 = vmatprep.subr.bf16.mxu0 %v807_v47 }
  0x36   :  { %764 = vmatprep.mubr.msk.bf16.mxu1 %vm850_vm0, %v849_v43  ;;  %763 = vmatpush3.bf16.msra.mxu1 %v821_v56 }
  0x38   :  { %741 = vmatpush3.bf16.msra.mxu0 %v808_v48 }
  0x39   :  { %742 = vmatprep.subr.bf16.mxu0 %v809_v49 }
  0x3c   :  { %743 = vmatpush3.bf16.msra.mxu0 %v810_v50 }
  0x3d   :  { %744 = vmatprep.subr.bf16.mxu0 %v811_v51  ;;  %765 = vmatmul.mubr.msk.bf16.vlgmr.msra.gmra.mrb[4].mxu1 %vm449_vm1, %v49_v0 }
  0x40   :  { %745 = vmatpush3.bf16.msra.mxu0 %v812_v52 }
  0x41   :  { %746 = vmatprep.subr.bf16.mxu0 %v813_v53 }
  0x44   :  { %747 = vmatpush3.bf16.msra.mxu0 %v814_v54 }
  0x45   :  { %748 = vmatprep.subr.bf16.mxu0 %v815_v55 }
  0x48   :  { %749 = vmatpush3.bf16.msra.mxu0 %v816_v59 }
  0x49   :  { %750 = vmatprep.subr.bf16.mxu0 %v817_v63 }
  0x4c   :  { %751 = vmatpush3.bf16.msra.mxu0 %v818_v1 }
  0x4d   :  { %752 = vmatprep.subr.bf16.mxu0 %v819_v2 }
  0x50   :  { %753 = vmatpush3.bf16.msra.mxu0 %v820_v3 }
  0x53   :  { %568 = vmatmul.mubr.bf16.vlgmr.msra.gmra.mrb[4].mxu0 %v47_v6 }
 0x106   :  { %v710_v7 = vpop.f32.mrb[0].mxu0 }
 0x107   :  { %v711_v9 = vpop.f32.mrb[1].mxu0 }
 0x108   :  { %v712_v10 = vadd.f32 %v711_v9, %v710_v7  ;;  %v713_v11 = vpop.f32.mrb[2].mxu0  ;;  %v732_v12 = vpop.f32.mrb[0].mxu1 }
 0x109   :  { %v714_v13 = vpop.f32.mrb[3].mxu0  ;;  %v733_v16 = vpop.f32.mrb[1].mxu1 }
 0x10a   :  { %v488_v14 = vadd.f32 %v712_v10, %v634_v8  ;;  %v715_v15 = vadd.f32 %v714_v13, %v713_v11  ;;  %v734_v17 = vadd.f32 %v733_v16, %v732_v12  ;;  %v735_v18 = vpop.f32.mrb[2].mxu1 }
 0x10b   :  { %v736_v20 = vpop.f32.mrb[3].mxu1 }
 0x10c   :  { %v491_v19 = vadd.f32 %v715_v15, %v634_v8  ;;  %v529_v21 = vadd.f32 %v734_v17, %v488_v14  ;;  %v737_v22 = vadd.f32 %v736_v20, %v735_v18 }
 0x10e   :  { %v532_v23 = vadd.f32 %v737_v22, %v491_v19 }
 0x110   :  { %v610_v24 = vpop.f32.mrb[4].mxu1 }
 0x111   :  { %v766_v25 = vpop.f32.mrb[5].mxu1 }
 0x112   :  { %v613_v26 = vpop.f32.mrb[6].mxu1 }
 0x113   :  { %v767_v27 = vpop.f32.mrb[7].mxu1 }
 0x126   :  { %v754_v28 = vpop.f32.mrb[4].mxu0 }
 0x127   :  { %v755_v29 = vpop.f32.mrb[5].mxu0 }
 0x128   :  { %v756_v30 = vadd.f32 %v755_v29, %v754_v28  ;;  %v757_v31 = vpop.f32.mrb[6].mxu0 }
 0x129   :  { %v758_v32 = vpop.f32.mrb[7].mxu0 }
 0x12a   :  { %v570_v33 = vadd.f32 %v756_v30, %v529_v21  ;;  %v759_v34 = vadd.f32 %v758_v32, %v757_v31 }
 0x12c   :  { %v611_v35 = vadd.f32 %v610_v24, %v570_v33  ;;  %v573_v36 = vadd.f32 %v759_v34, %v532_v23 }
 0x12e   :  { %v614_v37 = vadd.f32 %v613_v26, %v573_v36  ;;  %v617_v38 = vmax.f32 %v611_v35, 0.0 }
 0x130   :  { %v618_v39 = vmax.f32 %v614_v37, 0.0 }
 0x132   :  { %v692_v40 = vpack.c.bf16 %v618_v39, %v617_v38 }
 0x134   :  { %693 = vst [vmem:[%s934_s3] sm:$0xff] %v692_v40  }
 0x135   :  { %633 = vsyncpa [#allocation3], 1 }

</bundles_post_ra>
